<compile_context>
chip_gen: v6e
topology: v6e:2x2x1
jax: 0.10.0
libtpu: 0.0.40
codegen_flags: <defaults>
</compile_context>

<pallas_src>
import functools
import math

import jax
import jax.numpy as jnp
from jax import lax
from jax.experimental import pallas as pl
from jax.experimental.pallas import tpu as pltpu


def _mha_kernel(x_ref, mask_ref, wqkv_ref, bqkv_ref, wo_ref, bo_ref, out_ref,
                *, B, T, H, A):
    """One invocation processes the whole (B*T, E) row slab.

    MXU work:
      * 1 fused QKV projection  (B*T, E) @ (E, 3*H*A)     -- wide-N matmul
      * B*H small score / PV matmuls (inherently per batch & head)
      * 1 fused output proj     (B*T, H*A) @ (H*A, A_pad) -- lane-dense store
    MXU operands are bf16 with f32 accumulation; softmax stays f32.
    """
    HA = H * A
    scale = jnp.float32(1.0 / math.sqrt(A))

    # ---- fused Q/K/V projection: one wide matmul instead of 3*H narrow ones.
    xb = x_ref[...].astype(jnp.bfloat16)                                 # (B*T, E)
    qkv = jnp.dot(xb, wqkv_ref[...],
                  preferred_element_type=jnp.float32) + bqkv_ref[...]    # (B*T, 3*H*A) f32

    # ---- mask -> additive bias, computed ONCE (hoisted out of the head loop).
    #      Large finite negative instead of -inf avoids NaN on fully-masked rows.
    bias = jnp.where(mask_ref[...] == 0,
                     jnp.float32(-1e30), jnp.float32(0.0))               # (T, T)

    row_blocks = []
    for b in range(B):                       # B, H are small & static -> unrolled
        r = slice(b * T, (b + 1) * T)
        q_b = qkv[r, 0 * HA:1 * HA]          # (T, H*A)
        k_b = qkv[r, 1 * HA:2 * HA]
        v_b = qkv[r, 2 * HA:3 * HA]
        heads_b = []
        for h in range(H):
            c = slice(h * A, (h + 1) * A)
            qh = q_b[:, c].astype(jnp.bfloat16)                          # (T, A)
            kh = k_b[:, c].astype(jnp.bfloat16)
            vh = v_b[:, c].astype(jnp.bfloat16)
            # scores = q @ k^T (contract A on both sides; no explicit transpose)
            s = lax.dot_general(qh, kh, (((1,), (1,)), ((), ())),
                                preferred_element_type=jnp.float32)      # (T, T)
            s = s * scale + bias
            m = jnp.max(s, axis=-1, keepdims=True)
            p = jnp.exp(s - m)
            # approx reciprocal lowers to the (otherwise idle) EUP slot
            p = p * pl.reciprocal(jnp.sum(p, axis=-1, keepdims=True), approx=True)
            heads_b.append(jnp.dot(p.astype(jnp.bfloat16), vh,
                                   preferred_element_type=jnp.float32))  # (T, A)
        row_blocks.append(jnp.concatenate(heads_b, axis=-1))             # (T, H*A)
    heads = jnp.concatenate(row_blocks, axis=0)                          # (B*T, H*A)

    # ---- fused output projection (== concat + multi_head_linear), lane-dense N.
    out = jnp.dot(heads.astype(jnp.bfloat16), wo_ref[...],
                  preferred_element_type=jnp.float32) + bo_ref[...]      # (B*T, A_pad)
    out_ref[...] = out.astype(out_ref.dtype)


def multi_head_attention(x, mask, params):
    """x: [B, T, E] float32, mask: [T, T] (1 = attend, 0 = masked)."""
    B, T, E = x.shape
    H, _, A = params["wq"].shape
    HA = H * A
    A_pad = pl.cdiv(A, 128) * 128              # lane-dense output slab

    # --- wrapper-side layout plumbing (pure reshape/concat/pad, no extra compute)
    # fused QKV weight: column block h of each third equals W{q,k,v}[h]  (E, 3*H*A)
    to_cols = lambda w: jnp.transpose(w, (1, 0, 2)).reshape(E, HA)
    wqkv = jnp.concatenate(
        [to_cols(params["wq"]), to_cols(params["wk"]), to_cols(params["wv"])],
        axis=-1).astype(jnp.bfloat16)
    bqkv = jnp.concatenate(
        [params["bq"].reshape(1, HA), params["bk"].reshape(1, HA),
         params["bv"].reshape(1, HA)], axis=-1).astype(jnp.float32)
    # output projection, padded to 128 lanes for an unmasked store
    wo_pad = jnp.pad(params["wo"].reshape(HA, A),
                     ((0, 0), (0, A_pad - A))).astype(jnp.bfloat16)
    bo_pad = jnp.pad(params["bo"].reshape(1, A),
                     ((0, 0), (0, A_pad - A))).astype(jnp.float32)

    x2 = x.reshape(B * T, E)                   # fold batch into the row dim

    out = pl.pallas_call(
        functools.partial(_mha_kernel, B=B, T=T, H=H, A=A),
        out_shape=jax.ShapeDtypeStruct((B * T, A_pad), x.dtype),
        grid=(1,),                             # demo shapes: whole problem per step
        in_specs=[
            pl.BlockSpec((B * T, E), lambda i: (0, 0)),       # x rows
            pl.BlockSpec((T, T), lambda i: (0, 0)),           # mask
            pl.BlockSpec((E, 3 * HA), lambda i: (0, 0)),      # fused Wqkv (bf16)
            pl.BlockSpec((1, 3 * HA), lambda i: (0, 0)),      # fused bqkv
            pl.BlockSpec((HA, A_pad), lambda i: (0, 0)),      # Wo (padded, bf16)
            pl.BlockSpec((1, A_pad), lambda i: (0, 0)),       # bo (padded)
        ],
        out_specs=pl.BlockSpec((B * T, A_pad), lambda i: (0, 0)),
        compiler_params=pltpu.CompilerParams(
            dimension_semantics=("arbitrary",)),
    )(x2, mask, wqkv, bqkv, wo_pad, bo_pad)

    return out[:, :A].reshape(B, T, A)


def _reference(x, mask, params):
    """Plain-JAX f32 reference with the module's exact semantics."""
    H, E, A = params["wq"].shape
    heads = []
    for h in range(H):
        q = x @ params["wq"][h] + params["bq"][h]
        k = x @ params["wk"][h] + params["bk"][h]
        v = x @ params["wv"][h] + params["bv"][h]
        s = (q @ jnp.swapaxes(k, -1, -2)) / math.sqrt(A)
        s = jnp.where(mask == 0, -jnp.inf, s)
        p = jax.nn.softmax(s, axis=-1)
        heads.append(p @ v)
    cat = jnp.concatenate(heads, axis=-1)                  # (B, T, H*A)
    wo_flat = params["wo"].reshape(H * A, A)
    return cat @ wo_flat + params["bo"][0]


def init_params(key, embedding_dim, attention_dim, nb_heads):
    ks = jax.random.split(key, 8)
    s = 0.05
    return {
        "wq": s * jax.random.normal(ks[0], (nb_heads, embedding_dim, attention_dim), jnp.float32),
        "bq": s * jax.random.normal(ks[1], (nb_heads, 1, attention_dim), jnp.float32),
        "wk": s * jax.random.normal(ks[2], (nb_heads, embedding_dim, attention_dim), jnp.float32),
        "bk": s * jax.random.normal(ks[3], (nb_heads, 1, attention_dim), jnp.float32),
        "wv": s * jax.random.normal(ks[4], (nb_heads, embedding_dim, attention_dim), jnp.float32),
        "bv": s * jax.random.normal(ks[5], (nb_heads, 1, attention_dim), jnp.float32),
        "wo": s * jax.random.normal(ks[6], (nb_heads, attention_dim, attention_dim), jnp.float32),
        "bo": s * jax.random.normal(ks[7], (1, attention_dim), jnp.float32),
    }


if __name__ == "__main__":
    B, T, E, A, H = 2, 8, 32, 16, 4

    key = jax.random.PRNGKey(0)
    k_x, k_p = jax.random.split(key)
    x = jax.random.normal(k_x, (B, T, E), jnp.float32)
    mask = jnp.tril(jnp.ones((T, T), jnp.float32))         # causal mask, 1=keep
    params = init_params(k_p, E, A, H)

    out = multi_head_attention(x, mask, params)
    out = jax.block_until_ready(out)

    ref = _reference(x, mask, params)
    assert out.shape == (B, T, A), out.shape
    # bf16 MXU operands + approx reciprocal -> relaxed tolerance vs f32 reference
    err = jnp.max(jnp.abs(out - ref))
    assert jnp.allclose(out, ref, atol=2e-2, rtol=2e-2), f"max err {err}"
    print("KERNEL_OK")
</pallas_src>

<mosaic_0001>
module attributes {stable_mosaic.version = 11 : i64} {
  func.func @_mha_kernel(%arg0: i32, %arg1: memref<16x32xf32, #tpu.memory_space<vmem>>, %arg2: memref<8x8xf32, #tpu.memory_space<vmem>>, %arg3: memref<32x192xbf16, #tpu.memory_space<vmem>>, %arg4: memref<1x192xf32, #tpu.memory_space<vmem>>, %arg5: memref<64x128xbf16, #tpu.memory_space<vmem>>, %arg6: memref<1x128xf32, #tpu.memory_space<vmem>>, %arg7: memref<16x128xf32, #tpu.memory_space<vmem>>) attributes {dimension_semantics = [#tpu.dimension_semantics<arbitrary>], iteration_bounds = array<i64: 1>, scalar_prefetch = 0 : i64, scratch_operands = 0 : i64, tpu.core_type = #tpu.core_type<tc>, window_params = [{pipeline_mode = #tpu.pipeline_mode<synchronous>, transform_indices = @transform_0, window_bounds = array<i64: 16, 32>}, {pipeline_mode = #tpu.pipeline_mode<synchronous>, transform_indices = @transform_1, window_bounds = array<i64: 8, 8>}, {pipeline_mode = #tpu.pipeline_mode<synchronous>, transform_indices = @transform_2, window_bounds = array<i64: 32, 192>}, {pipeline_mode = #tpu.pipeline_mode<synchronous>, transform_indices = @transform_3, window_bounds = array<i64: 1, 192>}, {pipeline_mode = #tpu.pipeline_mode<synchronous>, transform_indices = @transform_4, window_bounds = array<i64: 64, 128>}, {pipeline_mode = #tpu.pipeline_mode<synchronous>, transform_indices = @transform_5, window_bounds = array<i64: 1, 128>}, {pipeline_mode = #tpu.pipeline_mode<synchronous>, transform_indices = @transform_6, window_bounds = array<i64: 16, 128>}]} {
    %c0 = arith.constant 0 : index
    %c0_0 = arith.constant 0 : index
    %0 = vector.load %arg1[%c0, %c0_0] : memref<16x32xf32, #tpu.memory_space<vmem>>, vector<16x32xf32>
    %1 = arith.truncf %0 : vector<16x32xf32> to vector<16x32xbf16>
    %c0_1 = arith.constant 0 : index
    %c0_2 = arith.constant 0 : index
    %2 = vector.load %arg3[%c0_1, %c0_2] : memref<32x192xbf16, #tpu.memory_space<vmem>>, vector<32x192xbf16>
    %cst = arith.constant dense<0.000000e+00> : vector<16x192xf32>
    %3 = tpu.matmul %1, %2, %cst {dimension_numbers = #tpu.dot_dimension_numbers<[1], [0], [0], [1], [0, 0, 1, 1], [], []>} : vector<16x32xbf16>, vector<32x192xbf16>, vector<16x192xf32> -> vector<16x192xf32>
    %c0_3 = arith.constant 0 : index
    %c0_4 = arith.constant 0 : index
    %4 = vector.load %arg4[%c0_3, %c0_4] : memref<1x192xf32, #tpu.memory_space<vmem>>, vector<1x192xf32>
    %5 = vector.broadcast %4 : vector<1x192xf32> to vector<16x192xf32>
    %6 = arith.addf %3, %5 : vector<16x192xf32>
    %c0_5 = arith.constant 0 : index
    %c0_6 = arith.constant 0 : index
    %7 = vector.load %arg2[%c0_5, %c0_6] : memref<8x8xf32, #tpu.memory_space<vmem>>, vector<8x8xf32>
    %cst_7 = arith.constant 0.000000e+00 : f32
    %8 = vector.broadcast %cst_7 : f32 to vector<8x8xf32>
    %9 = arith.cmpf oeq, %7, %8 : vector<8x8xf32>
    %cst_8 = arith.constant -1.000000e+30 : f32
    %cst_9 = arith.constant 0.000000e+00 : f32
    %10 = vector.broadcast %cst_8 : f32 to vector<8x8xf32>
    %11 = vector.broadcast %cst_9 : f32 to vector<8x8xf32>
    %12 = arith.select %9, %10, %11 : vector<8x8xi1>, vector<8x8xf32>
    %13 = vector.extract_strided_slice %6 {offsets = [0, 0], sizes = [8, 64], strides = [1, 1]} : vector<16x192xf32> to vector<8x64xf32>
    %14 = vector.extract_strided_slice %6 {offsets = [0, 64], sizes = [8, 64], strides = [1, 1]} : vector<16x192xf32> to vector<8x64xf32>
    %15 = vector.extract_strided_slice %6 {offsets = [0, 128], sizes = [8, 64], strides = [1, 1]} : vector<16x192xf32> to vector<8x64xf32>
    %16 = vector.extract_strided_slice %13 {offsets = [0, 0], sizes = [8, 16], strides = [1, 1]} : vector<8x64xf32> to vector<8x16xf32>
    %17 = arith.truncf %16 : vector<8x16xf32> to vector<8x16xbf16>
    %18 = vector.extract_strided_slice %14 {offsets = [0, 0], sizes = [8, 16], strides = [1, 1]} : vector<8x64xf32> to vector<8x16xf32>
    %19 = arith.truncf %18 : vector<8x16xf32> to vector<8x16xbf16>
    %20 = vector.extract_strided_slice %15 {offsets = [0, 0], sizes = [8, 16], strides = [1, 1]} : vector<8x64xf32> to vector<8x16xf32>
    %21 = arith.truncf %20 : vector<8x16xf32> to vector<8x16xbf16>
    %cst_10 = arith.constant dense<0.000000e+00> : vector<8x8xf32>
    %22 = tpu.matmul %17, %19, %cst_10 {dimension_numbers = #tpu.dot_dimension_numbers<[1], [1], [0], [0], [0, 0, 1, 0], [], []>} : vector<8x16xbf16>, vector<8x16xbf16>, vector<8x8xf32> -> vector<8x8xf32>
    %cst_11 = arith.constant 2.500000e-01 : f32
    %23 = vector.broadcast %cst_11 : f32 to vector<8x8xf32>
    %24 = arith.mulf %22, %23 : vector<8x8xf32>
    %25 = arith.addf %24, %12 : vector<8x8xf32>
    %cst_12 = arith.constant dense<0xFF800000> : vector<8xf32>
    %26 = vector.multi_reduction <maximumf>, %25, %cst_12 [1] : vector<8x8xf32> to vector<8xf32>
    %27 = vector.shape_cast %26 : vector<8xf32> to vector<8x1xf32>
    %28 = vector.broadcast %27 : vector<8x1xf32> to vector<8x8xf32>
    %29 = arith.subf %25, %28 : vector<8x8xf32>
    %30 = math.exp %29 : vector<8x8xf32>
    %cst_13 = arith.constant dense<0.000000e+00> : vector<8xf32>
    %31 = vector.multi_reduction <add>, %30, %cst_13 [1] : vector<8x8xf32> to vector<8xf32>
    %32 = vector.shape_cast %31 : vector<8xf32> to vector<8x1xf32>
    %33 = tpu.reciprocal %32 {approx = true} : vector<8x1xf32> -> vector<8x1xf32>
    %34 = vector.broadcast %33 : vector<8x1xf32> to vector<8x8xf32>
    %35 = arith.mulf %30, %34 : vector<8x8xf32>
    %36 = arith.truncf %35 : vector<8x8xf32> to vector<8x8xbf16>
    %cst_14 = arith.constant dense<0.000000e+00> : vector<8x16xf32>
    %37 = tpu.matmul %36, %21, %cst_14 {dimension_numbers = #tpu.dot_dimension_numbers<[1], [0], [0], [1], [0, 0, 1, 1], [], []>} : vector<8x8xbf16>, vector<8x16xbf16>, vector<8x16xf32> -> vector<8x16xf32>
    %38 = vector.extract_strided_slice %13 {offsets = [0, 16], sizes = [8, 16], strides = [1, 1]} : vector<8x64xf32> to vector<8x16xf32>
    %39 = arith.truncf %38 : vector<8x16xf32> to vector<8x16xbf16>
    %40 = vector.extract_strided_slice %14 {offsets = [0, 16], sizes = [8, 16], strides = [1, 1]} : vector<8x64xf32> to vector<8x16xf32>
    %41 = arith.truncf %40 : vector<8x16xf32> to vector<8x16xbf16>
    %42 = vector.extract_strided_slice %15 {offsets = [0, 16], sizes = [8, 16], strides = [1, 1]} : vector<8x64xf32> to vector<8x16xf32>
    %43 = arith.truncf %42 : vector<8x16xf32> to vector<8x16xbf16>
    %cst_15 = arith.constant dense<0.000000e+00> : vector<8x8xf32>
    %44 = tpu.matmul %39, %41, %cst_15 {dimension_numbers = #tpu.dot_dimension_numbers<[1], [1], [0], [0], [0, 0, 1, 0], [], []>} : vector<8x16xbf16>, vector<8x16xbf16>, vector<8x8xf32> -> vector<8x8xf32>
    %cst_16 = arith.constant 2.500000e-01 : f32
    %45 = vector.broadcast %cst_16 : f32 to vector<8x8xf32>
    %46 = arith.mulf %44, %45 : vector<8x8xf32>
    %47 = arith.addf %46, %12 : vector<8x8xf32>
    %cst_17 = arith.constant dense<0xFF800000> : vector<8xf32>
    %48 = vector.multi_reduction <maximumf>, %47, %cst_17 [1] : vector<8x8xf32> to vector<8xf32>
    %49 = vector.shape_cast %48 : vector<8xf32> to vector<8x1xf32>
    %50 = vector.broadcast %49 : vector<8x1xf32> to vector<8x8xf32>
    %51 = arith.subf %47, %50 : vector<8x8xf32>
    %52 = math.exp %51 : vector<8x8xf32>
    %cst_18 = arith.constant dense<0.000000e+00> : vector<8xf32>
    %53 = vector.multi_reduction <add>, %52, %cst_18 [1] : vector<8x8xf32> to vector<8xf32>
    %54 = vector.shape_cast %53 : vector<8xf32> to vector<8x1xf32>
    %55 = tpu.reciprocal %54 {approx = true} : vector<8x1xf32> -> vector<8x1xf32>
    %56 = vector.broadcast %55 : vector<8x1xf32> to vector<8x8xf32>
    %57 = arith.mulf %52, %56 : vector<8x8xf32>
    %58 = arith.truncf %57 : vector<8x8xf32> to vector<8x8xbf16>
    %cst_19 = arith.constant dense<0.000000e+00> : vector<8x16xf32>
    %59 = tpu.matmul %58, %43, %cst_19 {dimension_numbers = #tpu.dot_dimension_numbers<[1], [0], [0], [1], [0, 0, 1, 1], [], []>} : vector<8x8xbf16>, vector<8x16xbf16>, vector<8x16xf32> -> vector<8x16xf32>
    %60 = vector.extract_strided_slice %13 {offsets = [0, 32], sizes = [8, 16], strides = [1, 1]} : vector<8x64xf32> to vector<8x16xf32>
    %61 = arith.truncf %60 : vector<8x16xf32> to vector<8x16xbf16>
    %62 = vector.extract_strided_slice %14 {offsets = [0, 32], sizes = [8, 16], strides = [1, 1]} : vector<8x64xf32> to vector<8x16xf32>
    %63 = arith.truncf %62 : vector<8x16xf32> to vector<8x16xbf16>
    %64 = vector.extract_strided_slice %15 {offsets = [0, 32], sizes = [8, 16], strides = [1, 1]} : vector<8x64xf32> to vector<8x16xf32>
    %65 = arith.truncf %64 : vector<8x16xf32> to vector<8x16xbf16>
    %cst_20 = arith.constant dense<0.000000e+00> : vector<8x8xf32>
    %66 = tpu.matmul %61, %63, %cst_20 {dimension_numbers = #tpu.dot_dimension_numbers<[1], [1], [0], [0], [0, 0, 1, 0], [], []>} : vector<8x16xbf16>, vector<8x16xbf16>, vector<8x8xf32> -> vector<8x8xf32>
    %cst_21 = arith.constant 2.500000e-01 : f32
    %67 = vector.broadcast %cst_21 : f32 to vector<8x8xf32>
    %68 = arith.mulf %66, %67 : vector<8x8xf32>
    %69 = arith.addf %68, %12 : vector<8x8xf32>
    %cst_22 = arith.constant dense<0xFF800000> : vector<8xf32>
    %70 = vector.multi_reduction <maximumf>, %69, %cst_22 [1] : vector<8x8xf32> to vector<8xf32>
    %71 = vector.shape_cast %70 : vector<8xf32> to vector<8x1xf32>
    %72 = vector.broadcast %71 : vector<8x1xf32> to vector<8x8xf32>
    %73 = arith.subf %69, %72 : vector<8x8xf32>
    %74 = math.exp %73 : vector<8x8xf32>
    %cst_23 = arith.constant dense<0.000000e+00> : vector<8xf32>
    %75 = vector.multi_reduction <add>, %74, %cst_23 [1] : vector<8x8xf32> to vector<8xf32>
    %76 = vector.shape_cast %75 : vector<8xf32> to vector<8x1xf32>
    %77 = tpu.reciprocal %76 {approx = true} : vector<8x1xf32> -> vector<8x1xf32>
    %78 = vector.broadcast %77 : vector<8x1xf32> to vector<8x8xf32>
    %79 = arith.mulf %74, %78 : vector<8x8xf32>
    %80 = arith.truncf %79 : vector<8x8xf32> to vector<8x8xbf16>
    %cst_24 = arith.constant dense<0.000000e+00> : vector<8x16xf32>
    %81 = tpu.matmul %80, %65, %cst_24 {dimension_numbers = #tpu.dot_dimension_numbers<[1], [0], [0], [1], [0, 0, 1, 1], [], []>} : vector<8x8xbf16>, vector<8x16xbf16>, vector<8x16xf32> -> vector<8x16xf32>
    %82 = vector.extract_strided_slice %13 {offsets = [0, 48], sizes = [8, 16], strides = [1, 1]} : vector<8x64xf32> to vector<8x16xf32>
    %83 = arith.truncf %82 : vector<8x16xf32> to vector<8x16xbf16>
    %84 = vector.extract_strided_slice %14 {offsets = [0, 48], sizes = [8, 16], strides = [1, 1]} : vector<8x64xf32> to vector<8x16xf32>
    %85 = arith.truncf %84 : vector<8x16xf32> to vector<8x16xbf16>
    %86 = vector.extract_strided_slice %15 {offsets = [0, 48], sizes = [8, 16], strides = [1, 1]} : vector<8x64xf32> to vector<8x16xf32>
    %87 = arith.truncf %86 : vector<8x16xf32> to vector<8x16xbf16>
    %cst_25 = arith.constant dense<0.000000e+00> : vector<8x8xf32>
    %88 = tpu.matmul %83, %85, %cst_25 {dimension_numbers = #tpu.dot_dimension_numbers<[1], [1], [0], [0], [0, 0, 1, 0], [], []>} : vector<8x16xbf16>, vector<8x16xbf16>, vector<8x8xf32> -> vector<8x8xf32>
    %cst_26 = arith.constant 2.500000e-01 : f32
    %89 = vector.broadcast %cst_26 : f32 to vector<8x8xf32>
    %90 = arith.mulf %88, %89 : vector<8x8xf32>
    %91 = arith.addf %90, %12 : vector<8x8xf32>
    %cst_27 = arith.constant dense<0xFF800000> : vector<8xf32>
    %92 = vector.multi_reduction <maximumf>, %91, %cst_27 [1] : vector<8x8xf32> to vector<8xf32>
    %93 = vector.shape_cast %92 : vector<8xf32> to vector<8x1xf32>
    %94 = vector.broadcast %93 : vector<8x1xf32> to vector<8x8xf32>
    %95 = arith.subf %91, %94 : vector<8x8xf32>
    %96 = math.exp %95 : vector<8x8xf32>
    %cst_28 = arith.constant dense<0.000000e+00> : vector<8xf32>
    %97 = vector.multi_reduction <add>, %96, %cst_28 [1] : vector<8x8xf32> to vector<8xf32>
    %98 = vector.shape_cast %97 : vector<8xf32> to vector<8x1xf32>
    %99 = tpu.reciprocal %98 {approx = true} : vector<8x1xf32> -> vector<8x1xf32>
    %100 = vector.broadcast %99 : vector<8x1xf32> to vector<8x8xf32>
    %101 = arith.mulf %96, %100 : vector<8x8xf32>
    %102 = arith.truncf %101 : vector<8x8xf32> to vector<8x8xbf16>
    %cst_29 = arith.constant dense<0.000000e+00> : vector<8x16xf32>
    %103 = tpu.matmul %102, %87, %cst_29 {dimension_numbers = #tpu.dot_dimension_numbers<[1], [0], [0], [1], [0, 0, 1, 1], [], []>} : vector<8x8xbf16>, vector<8x16xbf16>, vector<8x16xf32> -> vector<8x16xf32>
    %104 = tpu.concatenate %37, %59, %81, %103 in 1 : vector<8x16xf32>, vector<8x16xf32>, vector<8x16xf32>, vector<8x16xf32> -> vector<8x64xf32>
    %105 = vector.extract_strided_slice %6 {offsets = [8, 0], sizes = [8, 64], strides = [1, 1]} : vector<16x192xf32> to vector<8x64xf32>
    %106 = vector.extract_strided_slice %6 {offsets = [8, 64], sizes = [8, 64], strides = [1, 1]} : vector<16x192xf32> to vector<8x64xf32>
    %107 = vector.extract_strided_slice %6 {offsets = [8, 128], sizes = [8, 64], strides = [1, 1]} : vector<16x192xf32> to vector<8x64xf32>
    %108 = vector.extract_strided_slice %105 {offsets = [0, 0], sizes = [8, 16], strides = [1, 1]} : vector<8x64xf32> to vector<8x16xf32>
    %109 = arith.truncf %108 : vector<8x16xf32> to vector<8x16xbf16>
    %110 = vector.extract_strided_slice %106 {offsets = [0, 0], sizes = [8, 16], strides = [1, 1]} : vector<8x64xf32> to vector<8x16xf32>
    %111 = arith.truncf %110 : vector<8x16xf32> to vector<8x16xbf16>
    %112 = vector.extract_strided_slice %107 {offsets = [0, 0], sizes = [8, 16], strides = [1, 1]} : vector<8x64xf32> to vector<8x16xf32>
    %113 = arith.truncf %112 : vector<8x16xf32> to vector<8x16xbf16>
    %cst_30 = arith.constant dense<0.000000e+00> : vector<8x8xf32>
    %114 = tpu.matmul %109, %111, %cst_30 {dimension_numbers = #tpu.dot_dimension_numbers<[1], [1], [0], [0], [0, 0, 1, 0], [], []>} : vector<8x16xbf16>, vector<8x16xbf16>, vector<8x8xf32> -> vector<8x8xf32>
    %cst_31 = arith.constant 2.500000e-01 : f32
    %115 = vector.broadcast %cst_31 : f32 to vector<8x8xf32>
    %116 = arith.mulf %114, %115 : vector<8x8xf32>
    %117 = arith.addf %116, %12 : vector<8x8xf32>
    %cst_32 = arith.constant dense<0xFF800000> : vector<8xf32>
    %118 = vector.multi_reduction <maximumf>, %117, %cst_32 [1] : vector<8x8xf32> to vector<8xf32>
    %119 = vector.shape_cast %118 : vector<8xf32> to vector<8x1xf32>
    %120 = vector.broadcast %119 : vector<8x1xf32> to vector<8x8xf32>
    %121 = arith.subf %117, %120 : vector<8x8xf32>
    %122 = math.exp %121 : vector<8x8xf32>
    %cst_33 = arith.constant dense<0.000000e+00> : vector<8xf32>
    %123 = vector.multi_reduction <add>, %122, %cst_33 [1] : vector<8x8xf32> to vector<8xf32>
    %124 = vector.shape_cast %123 : vector<8xf32> to vector<8x1xf32>
    %125 = tpu.reciprocal %124 {approx = true} : vector<8x1xf32> -> vector<8x1xf32>
    %126 = vector.broadcast %125 : vector<8x1xf32> to vector<8x8xf32>
    %127 = arith.mulf %122, %126 : vector<8x8xf32>
    %128 = arith.truncf %127 : vector<8x8xf32> to vector<8x8xbf16>
    %cst_34 = arith.constant dense<0.000000e+00> : vector<8x16xf32>
    %129 = tpu.matmul %128, %113, %cst_34 {dimension_numbers = #tpu.dot_dimension_numbers<[1], [0], [0], [1], [0, 0, 1, 1], [], []>} : vector<8x8xbf16>, vector<8x16xbf16>, vector<8x16xf32> -> vector<8x16xf32>
    %130 = vector.extract_strided_slice %105 {offsets = [0, 16], sizes = [8, 16], strides = [1, 1]} : vector<8x64xf32> to vector<8x16xf32>
    %131 = arith.truncf %130 : vector<8x16xf32> to vector<8x16xbf16>
    %132 = vector.extract_strided_slice %106 {offsets = [0, 16], sizes = [8, 16], strides = [1, 1]} : vector<8x64xf32> to vector<8x16xf32>
    %133 = arith.truncf %132 : vector<8x16xf32> to vector<8x16xbf16>
    %134 = vector.extract_strided_slice %107 {offsets = [0, 16], sizes = [8, 16], strides = [1, 1]} : vector<8x64xf32> to vector<8x16xf32>
    %135 = arith.truncf %134 : vector<8x16xf32> to vector<8x16xbf16>
    %cst_35 = arith.constant dense<0.000000e+00> : vector<8x8xf32>
    %136 = tpu.matmul %131, %133, %cst_35 {dimension_numbers = #tpu.dot_dimension_numbers<[1], [1], [0], [0], [0, 0, 1, 0], [], []>} : vector<8x16xbf16>, vector<8x16xbf16>, vector<8x8xf32> -> vector<8x8xf32>
    %cst_36 = arith.constant 2.500000e-01 : f32
    %137 = vector.broadcast %cst_36 : f32 to vector<8x8xf32>
    %138 = arith.mulf %136, %137 : vector<8x8xf32>
    %139 = arith.addf %138, %12 : vector<8x8xf32>
    %cst_37 = arith.constant dense<0xFF800000> : vector<8xf32>
    %140 = vector.multi_reduction <maximumf>, %139, %cst_37 [1] : vector<8x8xf32> to vector<8xf32>
    %141 = vector.shape_cast %140 : vector<8xf32> to vector<8x1xf32>
    %142 = vector.broadcast %141 : vector<8x1xf32> to vector<8x8xf32>
    %143 = arith.subf %139, %142 : vector<8x8xf32>
    %144 = math.exp %143 : vector<8x8xf32>
    %cst_38 = arith.constant dense<0.000000e+00> : vector<8xf32>
    %145 = vector.multi_reduction <add>, %144, %cst_38 [1] : vector<8x8xf32> to vector<8xf32>
    %146 = vector.shape_cast %145 : vector<8xf32> to vector<8x1xf32>
    %147 = tpu.reciprocal %146 {approx = true} : vector<8x1xf32> -> vector<8x1xf32>
    %148 = vector.broadcast %147 : vector<8x1xf32> to vector<8x8xf32>
    %149 = arith.mulf %144, %148 : vector<8x8xf32>
    %150 = arith.truncf %149 : vector<8x8xf32> to vector<8x8xbf16>
    %cst_39 = arith.constant dense<0.000000e+00> : vector<8x16xf32>
    %151 = tpu.matmul %150, %135, %cst_39 {dimension_numbers = #tpu.dot_dimension_numbers<[1], [0], [0], [1], [0, 0, 1, 1], [], []>} : vector<8x8xbf16>, vector<8x16xbf16>, vector<8x16xf32> -> vector<8x16xf32>
    %152 = vector.extract_strided_slice %105 {offsets = [0, 32], sizes = [8, 16], strides = [1, 1]} : vector<8x64xf32> to vector<8x16xf32>
    %153 = arith.truncf %152 : vector<8x16xf32> to vector<8x16xbf16>
    %154 = vector.extract_strided_slice %106 {offsets = [0, 32], sizes = [8, 16], strides = [1, 1]} : vector<8x64xf32> to vector<8x16xf32>
    %155 = arith.truncf %154 : vector<8x16xf32> to vector<8x16xbf16>
    %156 = vector.extract_strided_slice %107 {offsets = [0, 32], sizes = [8, 16], strides = [1, 1]} : vector<8x64xf32> to vector<8x16xf32>
    %157 = arith.truncf %156 : vector<8x16xf32> to vector<8x16xbf16>
    %cst_40 = arith.constant dense<0.000000e+00> : vector<8x8xf32>
    %158 = tpu.matmul %153, %155, %cst_40 {dimension_numbers = #tpu.dot_dimension_numbers<[1], [1], [0], [0], [0, 0, 1, 0], [], []>} : vector<8x16xbf16>, vector<8x16xbf16>, vector<8x8xf32> -> vector<8x8xf32>
    %cst_41 = arith.constant 2.500000e-01 : f32
    %159 = vector.broadcast %cst_41 : f32 to vector<8x8xf32>
    %160 = arith.mulf %158, %159 : vector<8x8xf32>
    %161 = arith.addf %160, %12 : vector<8x8xf32>
    %cst_42 = arith.constant dense<0xFF800000> : vector<8xf32>
    %162 = vector.multi_reduction <maximumf>, %161, %cst_42 [1] : vector<8x8xf32> to vector<8xf32>
    %163 = vector.shape_cast %162 : vector<8xf32> to vector<8x1xf32>
    %164 = vector.broadcast %163 : vector<8x1xf32> to vector<8x8xf32>
    %165 = arith.subf %161, %164 : vector<8x8xf32>
    %166 = math.exp %165 : vector<8x8xf32>
    %cst_43 = arith.constant dense<0.000000e+00> : vector<8xf32>
    %167 = vector.multi_reduction <add>, %166, %cst_43 [1] : vector<8x8xf32> to vector<8xf32>
    %168 = vector.shape_cast %167 : vector<8xf32> to vector<8x1xf32>
    %169 = tpu.reciprocal %168 {approx = true} : vector<8x1xf32> -> vector<8x1xf32>
    %170 = vector.broadcast %169 : vector<8x1xf32> to vector<8x8xf32>
    %171 = arith.mulf %166, %170 : vector<8x8xf32>
    %172 = arith.truncf %171 : vector<8x8xf32> to vector<8x8xbf16>
    %cst_44 = arith.constant dense<0.000000e+00> : vector<8x16xf32>
    %173 = tpu.matmul %172, %157, %cst_44 {dimension_numbers = #tpu.dot_dimension_numbers<[1], [0], [0], [1], [0, 0, 1, 1], [], []>} : vector<8x8xbf16>, vector<8x16xbf16>, vector<8x16xf32> -> vector<8x16xf32>
    %174 = vector.extract_strided_slice %105 {offsets = [0, 48], sizes = [8, 16], strides = [1, 1]} : vector<8x64xf32> to vector<8x16xf32>
    %175 = arith.truncf %174 : vector<8x16xf32> to vector<8x16xbf16>
    %176 = vector.extract_strided_slice %106 {offsets = [0, 48], sizes = [8, 16], strides = [1, 1]} : vector<8x64xf32> to vector<8x16xf32>
    %177 = arith.truncf %176 : vector<8x16xf32> to vector<8x16xbf16>
    %178 = vector.extract_strided_slice %107 {offsets = [0, 48], sizes = [8, 16], strides = [1, 1]} : vector<8x64xf32> to vector<8x16xf32>
    %179 = arith.truncf %178 : vector<8x16xf32> to vector<8x16xbf16>
    %cst_45 = arith.constant dense<0.000000e+00> : vector<8x8xf32>
    %180 = tpu.matmul %175, %177, %cst_45 {dimension_numbers = #tpu.dot_dimension_numbers<[1], [1], [0], [0], [0, 0, 1, 0], [], []>} : vector<8x16xbf16>, vector<8x16xbf16>, vector<8x8xf32> -> vector<8x8xf32>
    %cst_46 = arith.constant 2.500000e-01 : f32
    %181 = vector.broadcast %cst_46 : f32 to vector<8x8xf32>
    %182 = arith.mulf %180, %181 : vector<8x8xf32>
    %183 = arith.addf %182, %12 : vector<8x8xf32>
    %cst_47 = arith.constant dense<0xFF800000> : vector<8xf32>
    %184 = vector.multi_reduction <maximumf>, %183, %cst_47 [1] : vector<8x8xf32> to vector<8xf32>
    %185 = vector.shape_cast %184 : vector<8xf32> to vector<8x1xf32>
    %186 = vector.broadcast %185 : vector<8x1xf32> to vector<8x8xf32>
    %187 = arith.subf %183, %186 : vector<8x8xf32>
    %188 = math.exp %187 : vector<8x8xf32>
    %cst_48 = arith.constant dense<0.000000e+00> : vector<8xf32>
    %189 = vector.multi_reduction <add>, %188, %cst_48 [1] : vector<8x8xf32> to vector<8xf32>
    %190 = vector.shape_cast %189 : vector<8xf32> to vector<8x1xf32>
    %191 = tpu.reciprocal %190 {approx = true} : vector<8x1xf32> -> vector<8x1xf32>
    %192 = vector.broadcast %191 : vector<8x1xf32> to vector<8x8xf32>
    %193 = arith.mulf %188, %192 : vector<8x8xf32>
    %194 = arith.truncf %193 : vector<8x8xf32> to vector<8x8xbf16>
    %cst_49 = arith.constant dense<0.000000e+00> : vector<8x16xf32>
    %195 = tpu.matmul %194, %179, %cst_49 {dimension_numbers = #tpu.dot_dimension_numbers<[1], [0], [0], [1], [0, 0, 1, 1], [], []>} : vector<8x8xbf16>, vector<8x16xbf16>, vector<8x16xf32> -> vector<8x16xf32>
    %196 = tpu.concatenate %129, %151, %173, %195 in 1 : vector<8x16xf32>, vector<8x16xf32>, vector<8x16xf32>, vector<8x16xf32> -> vector<8x64xf32>
    %197 = tpu.concatenate %104, %196 in 0 : vector<8x64xf32>, vector<8x64xf32> -> vector<16x64xf32>
    %198 = arith.truncf %197 : vector<16x64xf32> to vector<16x64xbf16>
    %c0_50 = arith.constant 0 : index
    %c0_51 = arith.constant 0 : index
    %199 = vector.load %arg5[%c0_50, %c0_51] : memref<64x128xbf16, #tpu.memory_space<vmem>>, vector<64x128xbf16>
    %cst_52 = arith.constant dense<0.000000e+00> : vector<16x128xf32>
    %200 = tpu.matmul %198, %199, %cst_52 {dimension_numbers = #tpu.dot_dimension_numbers<[1], [0], [0], [1], [0, 0, 1, 1], [], []>} : vector<16x64xbf16>, vector<64x128xbf16>, vector<16x128xf32> -> vector<16x128xf32>
    %c0_53 = arith.constant 0 : index
    %c0_54 = arith.constant 0 : index
    %201 = vector.load %arg6[%c0_53, %c0_54] : memref<1x128xf32, #tpu.memory_space<vmem>>, vector<1x128xf32>
    %202 = vector.broadcast %201 : vector<1x128xf32> to vector<16x128xf32>
    %203 = arith.addf %200, %202 : vector<16x128xf32>
    %c0_55 = arith.constant 0 : index
    %c0_56 = arith.constant 0 : index
    %204 = vector.load %arg7[%c0_55, %c0_56] : memref<16x128xf32, #tpu.memory_space<vmem>>, vector<16x128xf32>
    tpu.vector_store %arg7[%c0_55, %c0_56], %203 {strides = array<i32>} : memref<16x128xf32, #tpu.memory_space<vmem>>, vector<16x128xf32>,
    return
  }
  func.func @transform_0(%arg0: i32) -> (i32, i32) {
    %c0_i32 = arith.constant 0 : i32
    %c0_i32_0 = arith.constant 0 : i32
    %c0_i32_1 = arith.constant 0 : i32
    return %c0_i32, %c0_i32_0 : i32, i32
  }
  func.func @transform_1(%arg0: i32) -> (i32, i32) {
    %c0_i32 = arith.constant 0 : i32
    %c0_i32_0 = arith.constant 0 : i32
    %c0_i32_1 = arith.constant 0 : i32
    return %c0_i32, %c0_i32_0 : i32, i32
  }
  func.func @transform_2(%arg0: i32) -> (i32, i32) {
    %c0_i32 = arith.constant 0 : i32
    %c0_i32_0 = arith.constant 0 : i32
    %c0_i32_1 = arith.constant 0 : i32
    return %c0_i32, %c0_i32_0 : i32, i32
  }
  func.func @transform_3(%arg0: i32) -> (i32, i32) {
    %c0_i32 = arith.constant 0 : i32
    %c0_i32_0 = arith.constant 0 : i32
    %c0_i32_1 = arith.constant 0 : i32
    return %c0_i32, %c0_i32_0 : i32, i32
  }
  func.func @transform_4(%arg0: i32) -> (i32, i32) {
    %c0_i32 = arith.constant 0 : i32
    %c0_i32_0 = arith.constant 0 : i32
    %c0_i32_1 = arith.constant 0 : i32
    return %c0_i32, %c0_i32_0 : i32, i32
  }
  func.func @transform_5(%arg0: i32) -> (i32, i32) {
    %c0_i32 = arith.constant 0 : i32
    %c0_i32_0 = arith.constant 0 : i32
    %c0_i32_1 = arith.constant 0 : i32
    return %c0_i32, %c0_i32_0 : i32, i32
  }
  func.func @transform_6(%arg0: i32) -> (i32, i32) {
    %c0_i32 = arith.constant 0 : i32
    %c0_i32_0 = arith.constant 0 : i32
    %c0_i32_1 = arith.constant 0 : i32
    return %c0_i32, %c0_i32_0 : i32, i32
  }
}

</mosaic_0001>

<bundles_post_ra>
// kernel: tpu_custom_call.1
= control target key start
LH: loop header
LB: loop body
LE: loop exit
PB: predicated region body
PF: predicated region fallthrough
CT: control target
= control target key end

     0   :  { %11 = vsyncpa [#allocation3], 0  ;;  %s1816_s0 = inlined_call_operand.hbm [shape: f32[16,32], index: 0, kind: input, shape index: {}]   ;;  %s1817_s1 = inlined_call_operand.hbm [shape: f32[8,8], index: 1, kind: input, shape index: {}]   ;;  %s1818_s2 = inlined_call_operand.hbm [shape: bf16[32,192], index: 2, kind: input, shape index: {}]   ;;  %s1819_s3 = inlined_call_operand.vmem [shape: f32[1,192], index: 3, kind: input, shape index: {}]   ;;  %s1820_s4 = inlined_call_operand.hbm [shape: bf16[64,128], index: 4, kind: input, shape index: {}]   ;;  %s1821_s5 = inlined_call_operand.vmem [shape: f32[1,128], index: 5, kind: input, shape index: {}]   ;;  %s1822_s6 = inlined_call_operand.hbm [shape: f32[16,128], index: 6, kind: output, shape index: {}]  }
   0x1   :  { %12 = vsyncpa [#allocation6], 0 }
   0x2   :  { %13 = vsyncpa [#allocation9], 0 }
   0x3   :  { %14 = vsyncpa [#allocation4], 0  ;;  %s1558_s21 = smov [#allocation5]   ;;  %s1559_s23 = smov [#allocation2]  }
   0x4   :  { %s33_s22 = sshll.u32 %s1558_s21, 4  ;;  %s20_s24 = sshll.u32 %s1559_s23, 4  ;;  %s34_s22 = int_to_ptr.vmem [resolvable:$true] %s33_s22  ;;  %s21_s24 = int_to_ptr.vmem [resolvable:$true] %s20_s24 }
   0x5   :  { %s1458_s25 = scalar_lea.vmem %s34_s22, 128  ;;  %p1463_p1 = scmp.lt.s32.totalorder %s34_s22, %s34_s22 }
   0x6   :  { %p1459_p0 = scmp.ne.s32.totalorder %s34_s22, %s1458_s25  ;;  %p1464_p2 = scmp.lt.s32.totalorder %s1458_s25, %s1458_s25 }
   0x8   :  { %p1465_p3 = por %p1464_p2, %p1463_p1 }
   0xa   :  { %p1466_p4 = pnand %p1465_p3, %p1459_p0 }
   0xc   :  { %1469 = shalt.err (!%p1466_p4)
}
   0xd   :  { %36 = dma.hbm_to_vmem [thread:$0]  %s1817_s1, 128, %s34_s22, [#allocation6]  }
   0xe   :  { %s1478_s28 = scalar_lea.vmem %s21_s24, 256  ;;  %p1483_p6 = scmp.lt.s32.totalorder %s21_s24, %s21_s24 }
   0xf   :  { %p1479_p5 = scmp.ne.s32.totalorder %s21_s24, %s1478_s28  ;;  %p1484_p7 = scmp.lt.s32.totalorder %s1478_s28, %s1478_s28 }
  0x11   :  { %p1485_p8 = por %p1484_p7, %p1483_p6 }
  0x13   :  { %p1486_p9 = pnand %p1485_p8, %p1479_p5 }
  0x15   :  { %1489 = shalt.err (!%p1486_p9)
}
  0x16   :  { %s1560_s29 = smov 128   ;;  %s1561_s30 = smov 8  }
  0x17   :  { %26 = dma.hbm_to_vmem [thread:$0]  %s1816_s0, 256, %s21_s24, [#allocation3], %s1560_s29, %s1560_s29, %s1561_s30  }
  0x18   :  { %s1562_s9 = smov [#allocation7]   ;;  %s1563_s11 = smov [#allocation8]  }
  0x19   :  { %s42_s10 = sshll.u32 %s1562_s9, 4  ;;  %s56_s1 = sshll.u32 %s1563_s11, 4  ;;  %s43_s10 = int_to_ptr.vmem [resolvable:$true] %s42_s10  ;;  %s57_s1 = int_to_ptr.vmem [resolvable:$true] %s56_s1 }
  0x1a   :  { %s1498_s12 = scalar_lea.vmem %s43_s10, 512  ;;  %p1503_p11 = scmp.lt.s32.totalorder %s43_s10, %s43_s10 }
  0x1b   :  { %p1499_p10 = scmp.ne.s32.totalorder %s43_s10, %s1498_s12  ;;  %p1504_p12 = scmp.lt.s32.totalorder %s1498_s12, %s1498_s12 }
  0x1d   :  { %p1505_p13 = por %p1504_p12, %p1503_p11 }
  0x1f   :  { %p1506_p0 = pnand %p1505_p13, %p1499_p10 }
  0x21   :  { %1509 = shalt.err (!%p1506_p0)
}
  0x22   :  { %48 = dma.hbm_to_vmem [thread:$0]  %s1818_s2, 512, %s43_s10, [#allocation6], %s1560_s29, %s1560_s29, %s1561_s30  }
  0x23   :  { %s1518_s0 = scalar_lea.vmem %s57_s1, 512  ;;  %p1523_p2 = scmp.lt.s32.totalorder %s57_s1, %s57_s1 }
  0x24   :  { %p1519_p1 = scmp.ne.s32.totalorder %s57_s1, %s1518_s0  ;;  %p1524_p3 = scmp.lt.s32.totalorder %s1518_s0, %s1518_s0 }
  0x26   :  { %p1525_p4 = por %p1524_p3, %p1523_p2 }
  0x28   :  { %p1526_p5 = pnand %p1525_p4, %p1519_p1 }
  0x2a   :  { %1529 = shalt.err (!%p1526_p5)
}
  0x2b   :  { %s1564_s15 = smov 64   ;;  %s1565_s16 = smov 4  }
  0x2c   :  { %62 = dma.hbm_to_vmem [thread:$0]  %s1820_s4, 512, %s57_s1, [#allocation9], %s1564_s15, %s1564_s15, %s1565_s16  }
  0x2d   :  { %1550 = dma.done.wait [#allocation3], 256  }
  0x2e   :  { %1551 = vsyncadd [#allocation3], 4294967040 }
  0x2f   :  { %1552 = dma.done.wait [#allocation6], 640  }
  0x30   :  { %1553 = vsyncadd [#allocation6], 4294966656 }
  0x31   :  { %1554 = dma.done.wait [#allocation9], 512  }
  0x32   :  { %1555 = vsyncadd [#allocation9], 4294966784  ;;  %v1566_v0 = vmov 0   ;;  %v1408_v1 = vld [vmem:[#allocation7 + $0x14] ss:$8 sps:$4 sm:$0xff]   ;;  %v78_v5 = vld [vmem:[#allocation2] sm:$0xff]  ;;  %v87_v9 = vlaneseq }
  0x33   :  { %153 = vmatprep.mubr.bf16.mxu0 %v1566_v0  ;;  %v1410_v2 = vld [vmem:[#allocation7 + $0x10] ss:$8 sps:$4 sm:$0xff]   ;;  %133 = vmatprep.subr.bf16.mxu0 %v1408_v1  ;;  %v1411_v3 = vld [vmem:[#allocation7 + $0x4] ss:$8 sps:$4 sm:$0xff]   ;;  %v1413_v4 = vld [vmem:[#allocation7] ss:$8 sps:$4 sm:$0xff]  }
  0x34   :  { %134 = vmatpush1.bf16.msra.mxu0 %v1410_v2  ;;  %v79_v6 = vld [vmem:[#allocation2 + $0x8] sm:$0xff]  ;;  %vm117_vm0 = vcmask 261120   ;;  %v1567_v8 = vmov 0.0   ;;  %v88_v10 = vshrl.u32 %v87_v9, 7  ;;  %v85_v12 = vld [vmem:[%s1819_s3] sm:$0x3] }
  0x35   :  { %135 = vmatprep.subr.bf16.mxu0 %v1411_v3  ;;  %v80_v7 = vpack.c.bf16 %v79_v6, %v78_v5  ;;  %1267 = vmatprep.subr.bf16.mxu1 %v1567_v8  ;;  %vm1568_vm1 = vmmov 0   ;;  %vm237_vm2 = vcmask 1043456   ;;  %s1569_s3 = smov 112   ;;  %s1570_s19 = smov 32   ;;  %vm172_vm3 = vcmask 130048   ;;  %v164_v48 = vld [vmem:[#allocation5] sm:$0xff] }
  0x36   :  { %v89_v11 = vsub.s32 0, %v88_v10  ;;  %v93_v13 = vsub.s32 1, %v88_v10  ;;  %1269 = vmatprep.mubr.msk.bf16.mxu1 %vm1568_vm1, %v1567_v8  ;;  %s1571_s20 = smov 48   ;;  %s1572_s21 = smov 16   ;;  %vm165_vm4 = vcmp.eq.f32.partialorder %v164_v48, 0.0  ;;  %vm221_vm5 = vcmask 64512  }
  0x37   :  { %s1573_s22 = smov 96   ;;  %s1574_s23 = smov 80   ;;  %v166_v50 = vsel %vm165_vm4, -1e+30, %v1567_v8  ;;  %vm632_vm6 = vcmask 392192   ;;  %vm1137_vm7 = vcmask 523264  }
  0x38   :  { %136 = vmatpush1.bf16.msra.mxu0 %v1413_v4  ;;  %v90_v14 = vrot.slane %v85_v12, %v89_v11  ;;  %v1641_v15 = vrot.slane %v85_v12, %v93_v13  ;;  %s1575_s26 = smov [#allocation10]  }
  0x39   :  { %1273 = vmatprep.subr.bf16.mxu0 %v1567_v8  ;;  %s1189_s27 = sshll.u32 %s1575_s26, 4  ;;  %s1190_s27 = int_to_ptr.vmem [resolvable:$true] %s1189_s27 }
  0x3a   :  { %s1530_s28 = scalar_lea.vmem %s1190_s27, 256  ;;  %p1535_p7 = scmp.lt.s32.totalorder %s1190_s27, %s1190_s27 }
  0x3b   :  { %1207 = vmatmul.mubr.msk.bf16.vlgmr.msra.gmra.mxu0 %vm117_vm0, %v80_v7  ;;  %p1531_p6 = scmp.ne.s32.totalorder %s1190_s27, %s1530_s28  ;;  %p1536_p8 = scmp.lt.s32.totalorder %s1530_s28, %s1530_s28 }
  0x3c   :  { %1275 = vmatprep.mubr.msk.bf16.mxu0 %vm1568_vm1, %v1567_v8 }
  0x3d   :  { %p1537_p9 = por %p1536_p8, %p1535_p7 }
  0x3f   :  { %p1538_p10 = pnand %p1537_p9, %p1531_p6 }
  0xfb   :  { %v155_v16 = vpop.f32.mrf.mxu0 }
  0xfc   :  { %v156_v17 = vadd.f32 %v155_v16, %v90_v14 }
  0xfd   :  { %v157_v18 = vpop.f32.mrf.mxu0 }
  0xfe   :  { %v167_v19 = vpack.c.bf16 %v156_v17, %v156_v17  ;;  %v158_v20 = vadd.f32 %v157_v18, %v1641_v15 }
  0xff   :  { %v159_v23 = vpop.f32.mrf.mxu0 }
 0x100   :  { %v1644_v21 = vpack.c.bf16 %v158_v20, %v158_v20  ;;  %281 = vrot.lane.b32.xlu1 %v167_v19, %s1569_s3  ;;  %170 = vrot.lane.b32.xlu0 %v167_v19, %s1564_s15  ;;  %v160_v24 = vadd.f32 %v159_v23, %v90_v14 }
 0x102   :  { %v239_v22 = vsel %vm237_vm2, %v1644_v21, 0  ;;  %v634_v25 = vpack.c.bf16 %v160_v24, %v160_v24 }
 0x103   :  { %1274 = vmatpush3.bf16.msra.mxu0 %v239_v22 }
 0x104   :  { %396 = vrot.lane.b32.xlu1 %v167_v19, %s1570_s19  ;;  %283 = vrot.lane.b32.xlu0 %v167_v19, %s1571_s20 }
 0x105   :  { %1285 = vmatprep.subr.bf16.mxu0 %v1567_v8 }
 0x108   :  { %508 = vrot.lane.b32.xlu1 %v167_v19, %s1572_s21  ;;  %394 = vrot.lane.b32.xlu0 %v167_v19, %s1573_s22 }
 0x10c   :  { %637 = vrot.lane.b32.xlu1 %v634_v25, %s1564_s15  ;;  %506 = vrot.lane.b32.xlu0 %v167_v19, %s1574_s23 }
 0x110   :  { %745 = vrot.lane.b32.xlu1 %v634_v25, %s1569_s3  ;;  %747 = vrot.lane.b32.xlu0 %v634_v25, %s1571_s20 }
 0x114   :  { %858 = vrot.lane.b32.xlu1 %v634_v25, %s1573_s22  ;;  %860 = vrot.lane.b32.xlu0 %v634_v25, %s1570_s19 }
 0x118   :  { %970 = vrot.lane.b32.xlu1 %v634_v25, %s1574_s23  ;;  %972 = vrot.lane.b32.xlu0 %v634_v25, %s1572_s21 }
 0x172   :  { %v171_v26 = vpop.permute.xlu0 %170  ;;  %v282_v29 = vpop.permute.xlu1 %281 }
 0x173   :  { %v177_v27 = vsel %vm172_vm3, %v171_v26, 0 }
 0x174   :  { %1268 = vmatpush3.bf16.xpose.msra.mxu1 %v177_v27 }
 0x175   :  { %1279 = vmatprep.subr.bf16.mxu1 %v1567_v8 }
 0x176   :  { %v284_v28 = vpop.permute.xlu0 %283  ;;  %v397_v31 = vpop.permute.xlu1 %396 }
 0x177   :  { %v289_v30 = vsel %vm172_vm3, %v284_v28, 0  ;;  %v402_v32 = vsel %vm172_vm3, %v397_v31, 0 }
 0x17a   :  { %v509_v33 = vpop.permute.xlu1 %508  ;;  %v395_v34 = vpop.permute.xlu0 %394 }
 0x17b   :  { %1270 = vmatmul.mubr.msk.bf16.vlgmr.msra.gmra.mxu1 %vm172_vm3, %v167_v19  ;;  %v514_v35 = vsel %vm172_vm3, %v509_v33, 0 }
 0x17c   :  { %1280 = vmatpush3.bf16.xpose.msra.mxu1 %v289_v30  ;;  %1281 = vmatprep.mubr.msk.bf16.mxu1 %vm1568_vm1, %v1567_v8 }
 0x17d   :  { %1291 = vmatprep.subr.bf16.mxu1 %v1567_v8 }
 0x17e   :  { %v638_v36 = vpop.permute.xlu1 %637  ;;  %v507_v37 = vpop.permute.xlu0 %506 }
 0x17f   :  { %v643_v38 = vsel %vm172_vm3, %v638_v36, 0 }
 0x182   :  { %v748_v39 = vpop.permute.xlu0 %747  ;;  %v746_v42 = vpop.permute.xlu1 %745 }
 0x183   :  { %1282 = vmatmul.mubr.msk.bf16.vlgmr.msra.gmra.mxu1 %vm172_vm3, %v282_v29  ;;  %v753_v40 = vsel %vm172_vm3, %v748_v39, 0 }
 0x184   :  { %1292 = vmatpush3.bf16.xpose.msra.mxu1 %v402_v32  ;;  %1293 = vmatprep.mubr.msk.bf16.mxu1 %vm1568_vm1, %v1567_v8 }
 0x185   :  { %1303 = vmatprep.subr.bf16.mxu1 %v1567_v8 }
 0x186   :  { %v861_v41 = vpop.permute.xlu0 %860  ;;  %v859_v45 = vpop.permute.xlu1 %858 }
 0x187   :  { %v866_v43 = vsel %vm172_vm3, %v861_v41, 0 }
 0x18a   :  { %v973_v44 = vpop.permute.xlu0 %972  ;;  %v971_v47 = vpop.permute.xlu1 %970 }
 0x18b   :  { %1294 = vmatmul.mubr.msk.bf16.vlgmr.msra.gmra.mxu1 %vm172_vm3, %v395_v34  ;;  %v978_v46 = vsel %vm172_vm3, %v973_v44, 0 }
 0x18c   :  { %1304 = vmatpush3.bf16.xpose.msra.mxu1 %v514_v35  ;;  %1305 = vmatprep.mubr.msk.bf16.mxu1 %vm1568_vm1, %v1567_v8 }
 0x18d   :  { %1315 = vmatprep.subr.bf16.mxu1 %v1567_v8 }
 0x193   :  { %1306 = vmatmul.mubr.msk.bf16.vlgmr.msra.gmra.mxu1 %vm172_vm3, %v507_v37 }
 0x194   :  { %1316 = vmatpush3.bf16.xpose.msra.mxu1 %v643_v38  ;;  %1317 = vmatprep.mubr.msk.bf16.mxu1 %vm1568_vm1, %v1567_v8 }
 0x195   :  { %1327 = vmatprep.subr.bf16.mxu1 %v1567_v8 }
 0x19b   :  { %1318 = vmatmul.mubr.msk.bf16.vlgmr.msra.gmra.mxu1 %vm172_vm3, %v634_v25 }
 0x19c   :  { %1328 = vmatpush3.bf16.xpose.msra.mxu1 %v753_v40  ;;  %1329 = vmatprep.mubr.msk.bf16.mxu1 %vm1568_vm1, %v1567_v8 }
 0x19d   :  { %1339 = vmatprep.subr.bf16.mxu1 %v1567_v8 }
 0x1a3   :  { %1330 = vmatmul.mubr.msk.bf16.vlgmr.msra.gmra.mxu1 %vm172_vm3, %v746_v42 }
 0x1a4   :  { %1340 = vmatpush3.bf16.xpose.msra.mxu1 %v866_v43  ;;  %1341 = vmatprep.mubr.msk.bf16.mxu1 %vm1568_vm1, %v1567_v8 }
 0x1a5   :  { %1351 = vmatprep.subr.bf16.mxu1 %v1567_v8 }
 0x1ab   :  { %1342 = vmatmul.mubr.msk.bf16.vlgmr.msra.gmra.mxu1 %vm172_vm3, %v859_v45 }
 0x1ac   :  { %1352 = vmatpush3.bf16.xpose.msra.mxu1 %v978_v46  ;;  %1353 = vmatprep.mubr.msk.bf16.mxu1 %vm1568_vm1, %v1567_v8 }
 0x1ad   :  { %1363 = vmatprep.subr.bf16.mxu1 %v1567_v8 }
 0x1b3   :  { %1354 = vmatmul.mubr.msk.bf16.vlgmr.msra.gmra.mxu1 %vm172_vm3, %v971_v47 }
 0x1b4   :  { %1371 = vmatprep.mubr.msk.bf16.mxu1 %vm1568_vm1, %v1567_v8 }
 0x23b   :  { %v213_v49 = vpop.f32.mrf.mxu1 }
 0x23c   :  { %v219_v51 = vmul.f32 0.25, %v213_v49 }
 0x23d   :  { %v1271_v52 = vpop.f32.mrf.mxu1 }
 0x23e   :  { %v1704_v53 = vadd.f32 %v219_v51, %v166_v50 }
 0x23f   :  { %v216_v54 = vpop.f32.mrf.mxu1 }
 0x240   :  { %v222_v55 = vsel %vm221_vm5, %v1704_v53, -inf }
 0x241   :  { %223 = vmax.xlane.f32.xlu0 %v222_v55  ;;  %v1272_v56 = vpop.f32.mrf.mxu1 }
 0x243   :  { %v325_v57 = vpop.f32.mrf.mxu1 }
 0x244   :  { %v331_v58 = vmul.f32 0.25, %v325_v57 }
 0x245   :  { %v1283_v59 = vpop.f32.mrf.mxu1 }
 0x246   :  { %v332_v60 = vadd.f32 %v331_v58, %v166_v50 }
 0x247   :  { %v328_v61 = vpop.f32.mrf.mxu1 }
 0x248   :  { %v333_v62 = vsel %vm221_vm5, %v332_v60, -inf }
 0x249   :  { %334 = vmax.xlane.f32.xlu1 %v333_v62  ;;  %v1284_v63 = vpop.f32.mrf.mxu1 }
 0x24b   :  { %v438_v0 = vpop.f32.mrf.mxu1 }
 0x24c   :  { %v444_v1 = vmul.f32 0.25, %v438_v0 }
 0x24d   :  { %v1295_v2 = vpop.f32.mrf.mxu1 }
 0x24e   :  { %v445_v3 = vadd.f32 %v444_v1, %v166_v50 }
 0x24f   :  { %v441_v4 = vpop.f32.mrf.mxu1 }
 0x250   :  { %v446_v5 = vsel %vm221_vm5, %v445_v3, -inf }
 0x251   :  { %447 = vmax.xlane.f32.xlu0 %v446_v5  ;;  %v1296_v6 = vpop.f32.mrf.mxu1 }
 0x253   :  { %v550_v7 = vpop.f32.mrf.mxu1 }
 0x254   :  { %v556_v9 = vmul.f32 0.25, %v550_v7 }
 0x255   :  { %v1307_v10 = vpop.f32.mrf.mxu1 }
 0x256   :  { %v557_v11 = vadd.f32 %v556_v9, %v166_v50 }
 0x257   :  { %v553_v12 = vpop.f32.mrf.mxu1 }
 0x258   :  { %v558_v13 = vsel %vm221_vm5, %v557_v11, -inf }
 0x259   :  { %559 = vmax.xlane.f32.xlu0 %v558_v13  ;;  %v1308_v14 = vpop.f32.mrf.mxu1 }
 0x25b   :  { %v679_v16 = vpop.f32.mrf.mxu1 }
 0x25c   :  { %v685_v17 = vmul.f32 0.25, %v679_v16 }
 0x25d   :  { %v1319_v18 = vpop.f32.mrf.mxu1 }
 0x25e   :  { %v1711_v19 = vadd.f32 %v685_v17, %v166_v50 }
 0x25f   :  { %v682_v20 = vpop.f32.mrf.mxu1 }
 0x260   :  { %v687_v22 = vsel %vm221_vm5, %v1711_v19, -inf }
 0x261   :  { %688 = vmax.xlane.f32.xlu1 %v687_v22  ;;  %v1320_v23 = vpop.f32.mrf.mxu1 }
 0x262   :  { %v161_v23 = vpop.f32.mrf.mxu0 }
 0x263   :  { %v789_v24 = vpop.f32.mrf.mxu1 }
 0x264   :  { %v795_v25 = vmul.f32 0.25, %v789_v24  ;;  %v162_v24 = vadd.f32 %v161_v23, %v1641_v15 }
 0x265   :  { %v1331_v26 = vpop.f32.mrf.mxu1 }
 0x266   :  { %v796_v27 = vadd.f32 %v795_v25, %v166_v50  ;;  %v635_v25 = vpack.c.bf16 %v162_v24, %v162_v24 }
 0x267   :  { %v792_v28 = vpop.f32.mrf.mxu1 }
 0x268   :  { %v797_v29 = vsel %vm221_vm5, %v796_v27, -inf }
 0x269   :  { %798 = vmax.xlane.f32.xlu0 %v797_v29  ;;  %v1332_v30 = vpop.f32.mrf.mxu1 }
 0x26b   :  { %v902_v31 = vpop.f32.mrf.mxu1 }
 0x26c   :  { %v908_v32 = vmul.f32 0.25, %v902_v31 }
 0x26d   :  { %v1343_v33 = vpop.f32.mrf.mxu1 }
 0x26e   :  { %v909_v34 = vadd.f32 %v908_v32, %v166_v50 }
 0x26f   :  { %v905_v35 = vpop.f32.mrf.mxu1 }
 0x270   :  { %v910_v36 = vsel %vm221_vm5, %v909_v34, -inf }
 0x271   :  { %911 = vmax.xlane.f32.xlu1 %v910_v36  ;;  %v1344_v37 = vpop.f32.mrf.mxu1 }
 0x273   :  { %v1014_v38 = vpop.f32.mrf.mxu1 }
 0x274   :  { %v1020_v39 = vmul.f32 0.25, %v1014_v38 }
 0x275   :  { %v1355_v40 = vpop.f32.mrf.mxu1 }
 0x276   :  { %v1021_v41 = vadd.f32 %v1020_v39, %v166_v50 }
 0x277   :  { %v1017_v42 = vpop.f32.mrf.mxu1 }
 0x278   :  { %v1022_v43 = vsel %vm221_vm5, %v1021_v41, -inf }
 0x279   :  { %1023 = vmax.xlane.f32.xlu0 %v1022_v43  ;;  %v1356_v44 = vpop.f32.mrf.mxu1 }
 0x2ca   :  { %v224_v45 = vpop.xlane.xlu0 %223 }
 0x2cb   :  { %v225_v46 = vsub.f32 %v1704_v53, %v224_v45 }
 0x2cd   :  { %v226_v47 = vmul.f32 1.442695, %v225_v46 }
 0x2cf   :  { %1418 = vpow2.f32 %v226_v47  ;;  %v703_v47 = vsel %vm237_vm2, %v635_v25, 0 }
 0x2d2   :  { %v335_v48 = vpop.xlane.xlu1 %334 }
 0x2d3   :  { %v336_v49 = vsub.f32 %v332_v60, %v335_v48 }
 0x2d5   :  { %v337_v51 = vmul.f32 1.442695, %v336_v49 }
 0x2d7   :  { %1420 = vpow2.f32 %v337_v51 }
 0x2da   :  { %v448_v52 = vpop.xlane.xlu0 %447 }
 0x2db   :  { %v449_v54 = vsub.f32 %v445_v3, %v448_v52 }
 0x2dc   :  { %v1419_v55 = vpop.eup %1418 }
 0x2dd   :  { %v450_v56 = vmul.f32 1.442695, %v449_v54  ;;  %v228_v50 = vsel %vm221_vm5, %v1419_v55, 0.0 }
 0x2de   :  { %229 = vadd.xlane.f32.xlu1 %v228_v50 }
 0x2df   :  { %1422 = vpow2.f32 %v450_v56 }
 0x2e2   :  { %v560_v57 = vpop.xlane.xlu0 %559 }
 0x2e3   :  { %v561_v58 = vsub.f32 %v557_v11, %v560_v57 }
 0x2e4   :  { %v1421_v59 = vpop.eup %1420 }
 0x2e5   :  { %v562_v61 = vmul.f32 1.442695, %v561_v58  ;;  %v339_v53 = vsel %vm221_vm5, %v1421_v59, 0.0 }
 0x2e6   :  { %340 = vadd.xlane.f32.xlu0 %v339_v53 }
 0x2e7   :  { %1424 = vpow2.f32 %v562_v61 }
 0x2ea   :  { %v689_v1 = vpop.xlane.xlu1 %688 }
 0x2eb   :  { %v690_v2 = vsub.f32 %v1711_v19, %v689_v1 }
 0x2ec   :  { %v1721_v62 = vpop.eup %1422 }
 0x2ed   :  { %v452_v60 = vsel %vm221_vm5, %v1721_v62, 0.0  ;;  %v691_v6 = vmul.f32 1.442695, %v690_v2 }
 0x2ee   :  { %453 = vadd.xlane.f32.xlu1 %v452_v60 }
 0x2ef   :  { %1426 = vpow2.f32 %v691_v6 }
 0x2f2   :  { %v799_v3 = vpop.xlane.xlu0 %798 }
 0x2f3   :  { %v800_v5 = vsub.f32 %v796_v27, %v799_v3 }
 0x2f4   :  { %v1725_v63 = vpop.eup %1424 }
 0x2f5   :  { %v564_v0 = vsel %vm221_vm5, %v1725_v63, 0.0  ;;  %v801_v10 = vmul.f32 1.442695, %v800_v5 }
 0x2f6   :  { %565 = vadd.xlane.f32.xlu0 %v564_v0 }
 0x2f7   :  { %1428 = vpow2.f32 %v801_v10 }
 0x2fa   :  { %v912_v4 = vpop.xlane.xlu1 %911 }
 0x2fb   :  { %v913_v7 = vsub.f32 %v909_v34, %v912_v4 }
 0x2fc   :  { %v1736_v14 = vpop.eup %1426 }
 0x2fd   :  { %v914_v11 = vmul.f32 1.442695, %v913_v7 }
 0x2ff   :  { %458 = vrot.lane.b32.xlu1 %v1644_v21, %s1573_s22  ;;  %1430 = vpow2.f32 %v914_v11 }
 0x302   :  { %v1024_v9 = vpop.xlane.xlu0 %1023 }
 0x303   :  { %570 = vrot.lane.b32.xlu1 %v1644_v21, %s1574_s23  ;;  %v1025_v12 = vsub.f32 %v1021_v41, %v1024_v9 }
 0x304   :  { %v1738_v16 = vpop.eup %1428 }
 0x305   :  { %v1026_v13 = vmul.f32 1.442695, %v1025_v12  ;;  %v803_v19 = vsel %vm221_vm5, %v1738_v16, 0.0 }
 0x307   :  { %1432 = vpow2.f32 %v1026_v13 }
 0x30c   :  { %346 = vrot.lane.b32.xlu0 %v1644_v21, %s1569_s3  ;;  %v693_v21 = vsel %vm221_vm5, %v1736_v14, 0.0  ;;  %v1742_v17 = vpop.eup %1430 }
 0x30d   :  { %v916_v18 = vsel %vm221_vm5, %v1742_v17, 0.0 }
 0x314   :  { %v1748_v20 = vpop.eup %1432 }
 0x315   :  { %v1028_v22 = vsel %vm221_vm5, %v1748_v20, 0.0 }
 0x327   :  { %694 = vadd.xlane.f32.xlu1 %v693_v21 }
 0x32b   :  { %917 = vadd.xlane.f32.xlu0 %v916_v18  ;;  %804 = vadd.xlane.f32.xlu1 %v803_v19 }
 0x32f   :  { %1029 = vadd.xlane.f32.xlu1 %v1028_v22 }
 0x340   :  { %922 = vrot.lane.b32.xlu1 %v635_v25, %s1573_s22 }
 0x341   :  { %810 = vrot.lane.b32.xlu0 %v635_v25, %s1569_s3 }
 0x345   :  { %1034 = vrot.lane.b32.xlu0 %v635_v25, %s1574_s23  ;;  %v1414_v25 = vld [vmem:[#allocation8 + $0x18] sm:$0xff]  }
 0x346   :  { %1364 = vmatpush3.bf16.msra.mxu1 %v1414_v25 }
 0x347   :  { %1365 = vmatprep.subr.bf16.mxu1 %v1567_v8 }
 0x367   :  { %v230_v26 = vpop.xlane.xlu1 %229 }
 0x368   :  { %1434 = vrcp.f32 %v230_v26 }
 0x36f   :  { %v341_v27 = vpop.xlane.xlu0 %340 }
 0x370   :  { %1436 = vrcp.f32 %v341_v27 }
 0x375   :  { %v1435_v28 = vpop.eup %1434 }
 0x376   :  { %v232_v29 = vmul.f32 %v1435_v28, %v1419_v55 }
 0x377   :  { %v454_v30 = vpop.xlane.xlu1 %453 }
 0x378   :  { %v233_v31 = vpack.c.bf16 %v232_v29, %v232_v29  ;;  %1438 = vrcp.f32 %v454_v30  ;;  %v1415_v29 = vld [vmem:[#allocation8 + $0x10] sm:$0xff]  }
 0x379   :  { %1366 = vmatpush3.bf16.msra.mxu1 %v1415_v29 }
 0x37a   :  { %1276 = vmatmul.mubr.msk.bf16.vlgmr.msra.gmra.mxu0 %vm221_vm5, %v233_v31  ;;  %1367 = vmatprep.subr.bf16.mxu1 %v1567_v8 }
 0x37b   :  { %1287 = vmatprep.mubr.msk.bf16.mxu0 %vm1568_vm1, %v1567_v8  ;;  %v459_v36 = vpop.permute.xlu1 %458 }
 0x37c   :  { %v464_v39 = vsel %vm237_vm2, %v459_v36, 0 }
 0x37d   :  { %v1437_v15 = vpop.eup %1436 }
 0x37e   :  { %v343_v33 = vmul.f32 %v1437_v15, %v1421_v59  ;;  %v1416_v15 = vld [vmem:[#allocation8 + $0x8] sm:$0xff]  }
 0x37f   :  { %v566_v32 = vpop.xlane.xlu0 %565  ;;  %v571_v41 = vpop.permute.xlu1 %570  ;;  %1368 = vmatpush3.bf16.msra.mxu1 %v1416_v15 }
 0x380   :  { %1440 = vrcp.f32 %v566_v32  ;;  %v344_v37 = vpack.c.bf16 %v343_v33, %v343_v33  ;;  %v576_v44 = vsel %vm237_vm2, %v571_v41, 0  ;;  %1369 = vmatprep.subr.bf16.mxu1 %v1567_v8 }
 0x383   :  { %v347_v34 = vpop.permute.xlu0 %346 }
 0x384   :  { %v352_v35 = vsel %vm237_vm2, %v347_v34, 0 }
 0x385   :  { %1286 = vmatpush3.bf16.msra.mxu0 %v352_v35  ;;  %v1439_v38 = vpop.eup %1438  ;;  %v1417_v35 = vld [vmem:[#allocation8] sm:$0xff]  }
 0x386   :  { %1297 = vmatprep.subr.bf16.mxu0 %v1567_v8  ;;  %v456_v40 = vmul.f32 %v1439_v38, %v1721_v62  ;;  %1370 = vmatpush3.bf16.msra.mxu1 %v1417_v35 }
 0x388   :  { %1288 = vmatmul.mubr.msk.bf16.vlgmr.msra.gmra.mxu0 %vm221_vm5, %v344_v37  ;;  %v457_v42 = vpack.c.bf16 %v456_v40, %v456_v40 }
 0x389   :  { %1298 = vmatpush3.bf16.msra.mxu0 %v464_v39  ;;  %1299 = vmatprep.mubr.msk.bf16.mxu0 %vm1568_vm1, %v1567_v8 }
 0x38a   :  { %1309 = vmatprep.subr.bf16.mxu0 %v1567_v8 }
 0x38d   :  { %v1441_v43 = vpop.eup %1440 }
 0x38e   :  { %v568_v45 = vmul.f32 %v1441_v43, %v1725_v63 }
 0x390   :  { %1300 = vmatmul.mubr.msk.bf16.vlgmr.msra.gmra.mxu0 %vm221_vm5, %v457_v42  ;;  %v569_v46 = vpack.c.bf16 %v568_v45, %v568_v45 }
 0x391   :  { %1310 = vmatpush3.bf16.msra.mxu0 %v576_v44  ;;  %1311 = vmatprep.mubr.msk.bf16.mxu0 %vm1568_vm1, %v1567_v8 }
 0x392   :  { %1321 = vmatprep.subr.bf16.mxu0 %v1567_v8 }
 0x398   :  { %1312 = vmatmul.mubr.msk.bf16.vlgmr.msra.gmra.mxu0 %vm221_vm5, %v569_v46 }
 0x399   :  { %1322 = vmatpush3.bf16.msra.mxu0 %v703_v47  ;;  %1323 = vmatprep.mubr.msk.bf16.mxu0 %vm1568_vm1, %v1567_v8 }
 0x39a   :  { %1333 = vmatprep.subr.bf16.mxu0 %v1567_v8 }
 0x3b0   :  { %v695_v48 = vpop.xlane.xlu1 %694 }
 0x3b1   :  { %1442 = vrcp.f32 %v695_v48 }
 0x3b4   :  { %v805_v49 = vpop.xlane.xlu1 %804  ;;  %v918_v51 = vpop.xlane.xlu0 %917 }
 0x3b5   :  { %1444 = vrcp.f32 %v805_v49 }
 0x3b6   :  { %1446 = vrcp.f32 %v918_v51 }
 0x3b8   :  { %v811_v55 = vpop.permute.xlu0 %810  ;;  %v1030_v57 = vpop.xlane.xlu1 %1029 }
 0x3b9   :  { %v816_v58 = vsel %vm237_vm2, %v811_v55, 0  ;;  %1448 = vrcp.f32 %v1030_v57 }
 0x3bc   :  { %v923_v61 = vpop.permute.xlu1 %922  ;;  %v1035_v0 = vpop.permute.xlu0 %1034 }
 0x3bd   :  { %v928_v60 = vsel %vm237_vm2, %v923_v61, 0  ;;  %v1040_v3 = vsel %vm237_vm2, %v1035_v0, 0 }
 0x3be   :  { %v1443_v52 = vpop.eup %1442 }
 0x3bf   :  { %v697_v54 = vmul.f32 %v1443_v52, %v1736_v14 }
 0x3c1   :  { %v698_v56 = vpack.c.bf16 %v697_v54, %v697_v54 }
 0x3c2   :  { %v1445_v50 = vpop.eup %1444 }
 0x3c3   :  { %1324 = vmatmul.mubr.msk.bf16.vlgmr.msra.gmra.mxu0 %vm221_vm5, %v698_v56  ;;  %v807_v59 = vmul.f32 %v1445_v50, %v1738_v16  ;;  %v1447_v62 = vpop.eup %1446 }
 0x3c4   :  { %1334 = vmatpush3.bf16.msra.mxu0 %v816_v58  ;;  %1335 = vmatprep.mubr.msk.bf16.mxu0 %vm1568_vm1, %v1567_v8  ;;  %v920_v63 = vmul.f32 %v1447_v62, %v1742_v17  ;;  %v1224_v62 = vld [vmem:[%s1821_s5] ss:$0 sm:$0xff] }
 0x3c5   :  { %1345 = vmatprep.subr.bf16.mxu0 %v1567_v8  ;;  %v808_v53 = vpack.c.bf16 %v807_v59, %v807_v59 }
 0x3c6   :  { %v921_v1 = vpack.c.bf16 %v920_v63, %v920_v63  ;;  %v1449_v2 = vpop.eup %1448 }
 0x3c7   :  { %v1032_v4 = vmul.f32 %v1449_v2, %v1748_v20 }
 0x3c9   :  { %v1033_v5 = vpack.c.bf16 %v1032_v4, %v1032_v4 }
 0x3cb   :  { %1336 = vmatmul.mubr.msk.bf16.vlgmr.msra.gmra.mxu0 %vm221_vm5, %v808_v53 }
 0x3cc   :  { %1346 = vmatpush3.bf16.msra.mxu0 %v928_v60  ;;  %1347 = vmatprep.mubr.msk.bf16.mxu0 %vm1568_vm1, %v1567_v8 }
 0x3cd   :  { %1357 = vmatprep.subr.bf16.mxu0 %v1567_v8 }
 0x3d3   :  { %1348 = vmatmul.mubr.msk.bf16.vlgmr.msra.gmra.mxu0 %vm221_vm5, %v921_v1 }
 0x3d4   :  { %1358 = vmatpush3.bf16.msra.mxu0 %v1040_v3  ;;  %1359 = vmatprep.mubr.msk.bf16.mxu0 %vm1568_vm1, %v1567_v8 }
 0x3db   :  { %1360 = vmatmul.mubr.msk.bf16.vlgmr.msra.gmra.mxu0 %vm221_vm5, %v1033_v5 }
 0x43a   :  { %v275_v6 = vpop.f32.mrf.mxu0 }
 0x43c   :  { %v1277_v7 = vpop.f32.mrf.mxu0 }
 0x43e   :  { %v278_v9 = vpop.f32.mrf.mxu0 }
 0x440   :  { %v1278_v10 = vpop.f32.mrf.mxu0 }
 0x448   :  { %v388_v11 = vpop.f32.mrf.mxu0 }
 0x44a   :  { %v1289_v12 = vpop.f32.mrf.mxu0 }
 0x44c   :  { %v391_v13 = vpop.f32.mrf.mxu0 }
 0x44e   :  { %v1290_v14 = vpop.f32.mrf.mxu0 }
 0x450   :  { %v500_v16 = vpop.f32.mrf.mxu0 }
 0x452   :  { %v1301_v21 = vpop.f32.mrf.mxu0 }
 0x454   :  { %v503_v17 = vpop.f32.mrf.mxu0 }
 0x456   :  { %v1302_v18 = vpop.f32.mrf.mxu0 }
 0x458   :  { %v612_v19 = vpop.f32.mrf.mxu0 }
 0x45a   :  { %v1313_v22 = vpop.f32.mrf.mxu0 }
 0x45c   :  { %v615_v23 = vpop.f32.mrf.mxu0 }
 0x45e   :  { %v1314_v24 = vpop.f32.mrf.mxu0 }
 0x483   :  { %v739_v20 = vpop.f32.mrf.mxu0 }
 0x485   :  { %v1325_v26 = vpop.f32.mrf.mxu0 }
 0x487   :  { %v742_v27 = vpop.f32.mrf.mxu0 }
 0x489   :  { %v1326_v28 = vpop.f32.mrf.mxu0 }
 0x48b   :  { %v852_v30 = vpop.f32.mrf.mxu0 }
 0x48c   :  { %v1393_v31 = vpack.i.bf16 %v852_v30, %v388_v11 }
 0x48d   :  { %v1337_v32 = vpop.f32.mrf.mxu0 }
 0x48e   :  { %1394 = vrot.lane.b32.xlu0 %v1393_v31, %s1572_s21 }
 0x48f   :  { %v855_v33 = vpop.f32.mrf.mxu0 }
 0x491   :  { %v1338_v34 = vpop.f32.mrf.mxu0 }
 0x493   :  { %v964_v36 = vpop.f32.mrf.mxu0 }
 0x494   :  { %v1398_v37 = vpack.i.bf16 %v964_v36, %v500_v16 }
 0x495   :  { %v1349_v38 = vpop.f32.mrf.mxu0 }
 0x496   :  { %1399 = vrot.lane.b32.xlu1 %v1398_v37, %s1570_s19 }
 0x497   :  { %v967_v39 = vpop.f32.mrf.mxu0 }
 0x499   :  { %v1350_v40 = vpop.f32.mrf.mxu0 }
 0x49b   :  { %v1076_v41 = vpop.f32.mrf.mxu0 }
 0x49c   :  { %v1403_v42 = vpack.i.bf16 %v1076_v41, %v612_v19 }
 0x49d   :  { %v1361_v43 = vpop.f32.mrf.mxu0 }
 0x49e   :  { %1404 = vrot.lane.b32.xlu0 %v1403_v42, %s1571_s20 }
 0x49f   :  { %v1079_v44 = vpop.f32.mrf.mxu0 }
 0x4a1   :  { %v1362_v45 = vpop.f32.mrf.mxu0 }
 0x500   :  { %v1395_v46 = vpop.permute.xlu0 %1394 }
 0x501   :  { %v1397_v48 = vunpack.i.h.bf16 %v1395_v46  ;;  %v1396_v8 = vunpack.i.l.bf16 %v1395_v46 }
 0x503   :  { %v1094_v54 = vsel %vm172_vm3, %v739_v20, %v1397_v48  ;;  %v630_v55 = vsel %vm172_vm3, %v275_v6, %v1396_v8 }
 0x508   :  { %v1400_v47 = vpop.permute.xlu1 %1399 }
 0x509   :  { %v1402_v49 = vunpack.i.h.bf16 %v1400_v47  ;;  %v1401_v51 = vunpack.i.l.bf16 %v1400_v47 }
 0x50b   :  { %v631_v57 = vsel %vm117_vm0, %v630_v55, %v1401_v51  ;;  %v1095_v58 = vsel %vm117_vm0, %v1094_v54, %v1402_v49 }
 0x510   :  { %v1405_v52 = vpop.permute.xlu0 %1404 }
 0x511   :  { %v1407_v56 = vunpack.i.h.bf16 %v1405_v52  ;;  %v1406_v50 = vunpack.i.l.bf16 %v1405_v52 }
 0x513   :  { %v633_v59 = vsel %vm632_vm6, %v631_v57, %v1406_v50  ;;  %v1096_v61 = vsel %vm632_vm6, %v1095_v58, %v1407_v56 }
 0x514   :  { %v1097_v53 = vpack.c.bf16 %v1096_v61, %v633_v59 }
 0x516   :  { %1372 = vmatmul.mubr.msk.bf16.vlgmr.msra.gmra.mxu1 %vm1137_vm7, %v1097_v53 }
 0x5d6   :  { %v1175_v60 = vpop.f32.mrf.mxu1 }
 0x5d7   :  { %v1176_v63 = vadd.f32 %v1224_v62, %v1175_v60 }
 0x5d8   :  { %v1373_v0 = vpop.f32.mrf.mxu1 }
 0x5d9   :  { %1182 = vst [vmem:[#allocation10] sm:$0xff] %v1176_v63 }
 0x5da   :  { %v1178_v1 = vpop.f32.mrf.mxu1 }
 0x5db   :  { %v1179_v2 = vadd.f32 %v1224_v62, %v1178_v1 }
 0x5dc   :  { %v1374_v3 = vpop.f32.mrf.mxu1 }
 0x5dd   :  { %1183 = vst [vmem:[#allocation10 + $0x8] sm:$0xff] %v1179_v2 }
 0x5de   :  { %1541 = shalt.err (!%p1538_p10)
}
 0x5df   :  { %1195 = dma.vmem_to_hbm [thread:$0]  %s1190_s27, 256, %s1822_s6, [#allocation4], %s1560_s29, %s1560_s29, %s1561_s30  }
 0x5e0   :  { %1556 = dma.done.wait [#allocation4], 256  }
 0x5e1   :  { %1557 = vsyncadd [#allocation4], 4294967040 }
 0x5e2   :  { %1199 = vsyncpa [#allocation3], 1 }
 0x5e3   :  { %1200 = vsyncpa [#allocation6], 1 }
 0x5e4   :  { %1201 = vsyncpa [#allocation9], 1 }
 0x5e5   :  { %1202 = vsyncpa [#allocation4], 1 }

</bundles_post_ra>
